<compile_context>
chip_gen: v7x
topology: tpu7x:2x2x1
jax: 0.10.0
libtpu: 0.0.40
codegen_flags: <defaults>
</compile_context>

<pallas_src>
import functools

import jax
import jax.numpy as jnp
from jax.experimental import pallas as pl
from jax.experimental.pallas import tpu as pltpu


def _round_up(x, m):
    return ((x + m - 1) // m) * m


def _vmem_cap_bytes():
    """Physical VMEM per core; conservative fallback = 64 MiB (v7x per-TC)."""
    try:
        info = pltpu.get_tpu_info()
        cap = getattr(info, "vmem_capacity_bytes", None)
        if cap:
            return int(cap)
    except Exception:
        pass
    return 64 << 20


# ---------------------------------------------------------------------------
# Prologue kernel (runs ONCE at init): row-normalize a padded, transposed
# weight, fold in tau, emit bf16 for the MXU.  Row-tiled so huge widths never
# need the whole f32 weight resident in VMEM.
# ---------------------------------------------------------------------------
def _normalize_rows_kernel(w_ref, o_ref, *, tau):
    w = w_ref[...].astype(jnp.float32)
    ssq = jnp.sum(w * w, axis=1, keepdims=True)
    # torch: W / max(||W||, 1e-12); clamp the squared norm, rsqrt (EUP) * mul,
    # tau folded into the scale.  All in f32 (v5e-safe).
    inv = tau * jax.lax.rsqrt(jnp.maximum(ssq, 1e-24))
    o_ref[...] = (w * inv).astype(o_ref.dtype)


def _normalize_weight_t(wt_pad, tau, out_dtype=jnp.bfloat16):
    rows, cols = wt_pad.shape
    if rows <= 512 or rows % 8 != 0:
        tile_r = rows                       # small / odd row count: single block
    elif rows % 512 == 0:
        tile_r = 512
    elif rows % 256 == 0:
        tile_r = 256
    else:
        tile_r = 128                        # padded rows are a multiple of 128
    return pl.pallas_call(
        functools.partial(_normalize_rows_kernel, tau=tau),
        out_shape=jax.ShapeDtypeStruct((rows, cols), out_dtype),
        grid=(rows // tile_r,),
        in_specs=[pl.BlockSpec((tile_r, cols), lambda i: (i, 0))],
        out_specs=pl.BlockSpec((tile_r, cols), lambda i: (i, 0)),
        compiler_params=pltpu.CompilerParams(
            dimension_semantics=("parallel",)),
    )(wt_pad)


# ---------------------------------------------------------------------------
# Fused forward kernel: relu(x @ Wb') -> deep * relu(. @ Wm') -> . @ We'
# (the W*' are tau-scaled, column-normalized bf16 weights, VMEM-resident.)
# ---------------------------------------------------------------------------
def _forward_kernel(x_ref, wbn_ref, wmn_ref, wen_ref, o_ref, *, deep):
    wb = wbn_ref[...]
    wm = wmn_ref[...]
    we = wen_ref[...]

    h = jnp.dot(x_ref[...], wb, preferred_element_type=jnp.float32)
    h = jnp.maximum(h, 0.0)

    def mid(hh):
        y = jnp.dot(hh.astype(jnp.bfloat16), wm,
                    preferred_element_type=jnp.float32)
        return jnp.maximum(y, 0.0)

    if deep <= 4:
        for _ in range(deep):               # shared middle weight, unrolled
            h = mid(h)
    else:
        h = jax.lax.fori_loop(0, deep, lambda _, hh: mid(hh), h)

    y = jnp.dot(h.astype(jnp.bfloat16), we, preferred_element_type=jnp.float32)
    o_ref[...] = y.astype(o_ref.dtype)


class NormalizeDNNPallas:
    """JAX/Pallas port of normalizeDNN (parameters created deterministically)."""

    def __init__(self, input_size, width, deep, output_size, tau=0.5, key=None):
        self.input_size = int(input_size)
        self.width = int(width)
        self.deep = int(deep)
        self.output_size = int(output_size)
        self.tau = float(tau)

        if key is None:
            key = jax.random.PRNGKey(0)
        k_beg, k_mid, k_end = jax.random.split(key, 3)

        def _linear_weight(k, out_f, in_f):
            # nn.Linear default init: U(-1/sqrt(in_f), 1/sqrt(in_f))
            bound = 1.0 / jnp.sqrt(jnp.float32(in_f))
            return jax.random.uniform(k, (out_f, in_f), jnp.float32, -bound, bound)

        # PyTorch layout: W is (out_features, in_features); the SAME
        # middleLinear module is reused `deep` times -> shared weight.
        self.w_beg = _linear_weight(k_beg, width, input_size)
        self.w_mid = _linear_weight(k_mid, width, width)
        self.w_end = _linear_weight(k_end, output_size, width)

        # Lane-dense padded feature dims (multiples of 128).  x's own feature
        # dim stays UNPADDED (full-dim last axis is exempt from the 128 rule).
        self.w_pad = _round_up(self.width, 128)
        self.out_pad = _round_up(self.output_size, 128)

        def _pad_t(w, rows, cols):
            wt = w.T  # (in_features, out_features)
            return jnp.pad(wt, ((0, rows - wt.shape[0]), (0, cols - wt.shape[1])))

        wbt = _pad_t(self.w_beg, self.input_size, self.w_pad)
        wmt = _pad_t(self.w_mid, self.w_pad, self.w_pad)
        wet = _pad_t(self.w_end, self.w_pad, self.out_pad)

        # Prologue hoisted to init: normalize + tau-scale each weight ONCE and
        # keep the bf16 MXU operands around for every forward call.
        self.wbn = _normalize_weight_t(wbt, self.tau)
        self.wmn = _normalize_weight_t(wmt, self.tau)
        self.wen = _normalize_weight_t(wet, self.tau)

    # -- fused forward --------------------------------------------------------
    def __call__(self, x):
        x = x.reshape(-1, self.input_size)
        n = x.shape[0]

        # Row tiling: target ~512-row tiles, but derive tile_n from n so
        # awkward batch sizes aren't padded up to a full 512 multiple, and
        # force >= 2 tiles when n >= 512 so the "parallel" grid axis can shard
        # across v7x's 2 TensorCores.  (On v6e's 128 MiB VMEM a 1024-row tile
        # would also fit; 512 is the generation-safe choice.)
        if n >= 512:
            n_tiles = max(2, pl.cdiv(n, 512))
            tile_n = _round_up(pl.cdiv(n, n_tiles), 16)   # 16: bf16 sublane pack
        else:
            n_tiles = 1
            tile_n = _round_up(max(n, 16), 16)
        n_pad = tile_n * n_tiles

        # bf16 input on the host: halves x DMA and its double-buffered tile.
        x_pad = jnp.pad(x.astype(jnp.bfloat16), ((0, n_pad - n), (0, 0)))

        # Explicit VMEM budget (weights single-buffered, x/out double-buffered,
        # f32 h + bf16 h copy), capped below physical VMEM per generation.
        w_bytes = (self.input_size * self.w_pad + self.w_pad * self.w_pad
                   + self.w_pad * self.out_pad) * 2        # bf16, Buffered(1)
        x_bytes = 2 * tile_n * self.input_size * 2          # bf16, 2 buffers
        o_bytes = 2 * tile_n * self.out_pad * 4              # f32, 2 buffers
        act_bytes = tile_n * self.w_pad * (4 + 2) * 2         # h f32 + bf16 copy
        need = w_bytes + x_bytes + o_bytes + act_bytes
        cap = int(0.9 * _vmem_cap_bytes())
        vmem_limit = min(cap, max(2 * need, 32 << 20))
        # TODO(synk): at very large width (w_pad >= ~4096) on v7x (64 MiB VMEM),
        # K-tile the middle matmul (extra grid axis / emit_pipeline) instead of
        # keeping the full Wm resident.

        weight_spec = lambda shape: pl.BlockSpec(        # constant block:
            shape, lambda i: (0, 0), pipeline_mode=pl.Buffered(1))  # VMEM-resident

        out = pl.pallas_call(
            functools.partial(_forward_kernel, deep=self.deep),
            out_shape=jax.ShapeDtypeStruct((n_pad, self.out_pad), jnp.float32),
            grid_spec=pltpu.PrefetchScalarGridSpec(
                num_scalar_prefetch=0,
                grid=(n_tiles,),
                in_specs=[
                    pl.BlockSpec((tile_n, self.input_size), lambda i: (i, 0)),
                    weight_spec((self.input_size, self.w_pad)),
                    weight_spec((self.w_pad, self.w_pad)),
                    weight_spec((self.w_pad, self.out_pad)),
                ],
                out_specs=pl.BlockSpec((tile_n, self.out_pad), lambda i: (i, 0)),
            ),
            compiler_params=pltpu.CompilerParams(
                # Independent row tiles -> shards across 2 TensorCores on v7x.
                dimension_semantics=("parallel",),
                vmem_limit_bytes=vmem_limit,
            ),
        )(x_pad, self.wbn, self.wmn, self.wen)

        return out[:n, : self.output_size]

    # -- pure-JAX f32 reference of the exact PyTorch semantics ---------------
    def reference(self, x):
        x = x.reshape(-1, self.input_size).astype(jnp.float32)

        def layer(h, w, relu):
            wn = w / jnp.maximum(jnp.linalg.norm(w, axis=0, keepdims=True), 1e-12)
            y = self.tau * (h @ wn.T)
            return jnp.maximum(y, 0.0) if relu else y

        h = layer(x, self.w_beg, True)
        for _ in range(self.deep):
            h = layer(h, self.w_mid, True)
        return layer(h, self.w_end, False)


if __name__ == "__main__":
    input_size, width, deep, output_size = 8, 32, 2, 4
    batch = 2

    model = NormalizeDNNPallas(input_size, width, deep, output_size, tau=0.5,
                               key=jax.random.PRNGKey(0))

    x = jax.random.normal(jax.random.PRNGKey(1), (batch, input_size), jnp.float32)

    out = jax.block_until_ready(model(x))
    ref = model.reference(x)

    assert out.shape == (batch, output_size), out.shape
    # bf16 MXU operands (f32 accumulation) -> allow small numerical drift.
    assert jnp.allclose(out, ref, atol=1e-2, rtol=5e-2), (out, ref)

    print("KERNEL_OK")
</pallas_src>

<mosaic_0001>
module attributes {stable_mosaic.version = 11 : i64} {
  func.func @_normalize_rows_kernel(%arg0: i32, %arg1: memref<8x128xf32, #tpu.memory_space<vmem>>, %arg2: memref<8x128xbf16, #tpu.memory_space<vmem>>) attributes {dimension_semantics = [#tpu.dimension_semantics<parallel>], iteration_bounds = array<i64: 1>, scalar_prefetch = 0 : i64, scratch_operands = 0 : i64, tpu.core_type = #tpu.core_type<tc>, window_params = [{transform_indices = @transform_0, window_bounds = array<i64: 8, 128>}, {transform_indices = @transform_1, window_bounds = array<i64: 8, 128>}]} {
    %c0 = arith.constant 0 : index
    %c0_0 = arith.constant 0 : index
    %0 = vector.load %arg1[%c0, %c0_0] : memref<8x128xf32, #tpu.memory_space<vmem>>, vector<8x128xf32>
    %1 = arith.mulf %0, %0 : vector<8x128xf32>
    %cst = arith.constant dense<0.000000e+00> : vector<8xf32>
    %2 = vector.multi_reduction <add>, %1, %cst [1] : vector<8x128xf32> to vector<8xf32>
    %3 = vector.shape_cast %2 : vector<8xf32> to vector<8x1xf32>
    %cst_1 = arith.constant 1.000000e-24 : f32
    %4 = vector.broadcast %cst_1 : f32 to vector<8x1xf32>
    %5 = arith.maximumf %3, %4 : vector<8x1xf32>
    %6 = math.rsqrt %5 : vector<8x1xf32>
    %cst_2 = arith.constant 5.000000e-01 : f32
    %7 = vector.broadcast %cst_2 : f32 to vector<8x1xf32>
    %8 = arith.mulf %7, %6 : vector<8x1xf32>
    %9 = vector.broadcast %8 : vector<8x1xf32> to vector<8x128xf32>
    %10 = arith.mulf %0, %9 : vector<8x128xf32>
    %11 = arith.truncf %10 : vector<8x128xf32> to vector<8x128xbf16>
    %c0_3 = arith.constant 0 : index
    %c0_4 = arith.constant 0 : index
    %12 = vector.load %arg2[%c0_3, %c0_4] : memref<8x128xbf16, #tpu.memory_space<vmem>>, vector<8x128xbf16>
    tpu.vector_store %arg2[%c0_3, %c0_4], %11 {strides = array<i32>} : memref<8x128xbf16, #tpu.memory_space<vmem>>, vector<8x128xbf16>,
    return
  }
  func.func @transform_0(%arg0: i32) -> (i32, i32) {
    %c0_i32 = arith.constant 0 : i32
    %c0_i32_0 = arith.constant 0 : i32
    return %arg0, %c0_i32 : i32, i32
  }
  func.func @transform_1(%arg0: i32) -> (i32, i32) {
    %c0_i32 = arith.constant 0 : i32
    %c0_i32_0 = arith.constant 0 : i32
    return %arg0, %c0_i32 : i32, i32
  }
}

</mosaic_0001>

<bundles_post_ra>
// kernel: tpu_custom_call.1
= control target key start
LH: loop header
LB: loop body
LE: loop exit
PB: predicated region body
PF: predicated region fallthrough
CT: control target
= control target key end

     0   :  { %6 = vsyncpa [#allocation3], 0  ;;  %s134_s0 = inlined_call_operand.hbm [shape: f32[8,128], index: 0, kind: input, shape index: {}]   ;;  %s135_s1 = inlined_call_operand.hbm [shape: bf16[8,128], index: 1, kind: output, shape index: {}]  }
   0x1   :  { %7 = vsyncpa [#allocation4], 0  ;;  %s98_s6 = smov [#allocation2]   ;;  %s50_s10 = scalar_lea.hbm %s134_s0, 128 }
   0x2   :  { %s14_s7 = sshll.u32 %s98_s6, 4  ;;  %p51_p0 = scmp.ne.s32.totalorder %s134_s0, %s50_s10  ;;  %s15_s7 = int_to_ptr.vmem [resolvable:$true] %s14_s7 }
   0x3   :  { %p54_p1 = scmp.lt.u32.totalorder %s50_s10, %s134_s0 }
   0x5   :  { %p56_p2 = pnand %p54_p1, %p51_p0 }
   0x7   :  { %59 = shalt.err (!%p56_p2)
}
   0x8   :  { %s60_s15 = scalar_lea.vmem %s15_s7, 128  ;;  %p65_p4 = scmp.lt.s32.totalorder %s15_s7, %s15_s7 }
   0x9   :  { %p61_p3 = scmp.ne.s32.totalorder %s15_s7, %s60_s15  ;;  %p66_p5 = scmp.lt.s32.totalorder %s60_s15, %s60_s15 }
   0xb   :  { %p67_p6 = por %p66_p5, %p65_p4 }
   0xd   :  { %p68_p7 = pnand %p67_p6, %p61_p3 }
   0xf   :  { %71 = shalt.err (!%p68_p7)
}
  0x10   :  { %17 = dma.hbm_to_vmem [thread:$0]  %s134_s0, 128, %s15_s7, [#allocation3]  }
  0x11   :  { %94 = dma.done.wait [#allocation3], 128  }
  0x12   :  { %95 = vsyncadd [#allocation3], 4294967168  ;;  %v21_v0 = vld [vmem:[#allocation2] sm:$0xff]  ;;  %s99_s18 = smov [#allocation5]  }
  0x13   :  { %v22_v1 = vmul.f32 %v21_v0, %v21_v0  ;;  %s37_s19 = sshll.u32 %s99_s18, 4  ;;  %s38_s19 = int_to_ptr.vmem [resolvable:$true] %s37_s19 }
  0x14   :  { %s72_s20 = scalar_lea.vmem %s38_s19, 64  ;;  %p77_p9 = scmp.lt.s32.totalorder %s38_s19, %s38_s19 }
  0x15   :  { %23 = vadd.xlane.f32.xlu0 %v22_v1  ;;  %p73_p8 = scmp.ne.s32.totalorder %s38_s19, %s72_s20  ;;  %p78_p10 = scmp.lt.s32.totalorder %s72_s20, %s72_s20 }
  0x17   :  { %p79_p11 = por %p78_p10, %p77_p9 }
  0x19   :  { %p80_p12 = pnand %p79_p11, %p73_p8 }
  0xa2   :  { %v24_v2 = vpop.xlane.xlu0 %23 }
  0xa3   :  { %v25_v3 = vmax.f32 %v24_v2, 1e-24 }
  0xa5   :  { %48 = vrsqrt.f32 %v25_v3 }
  0xaf   :  { %v49_v4 = vpop.eup %48 }
  0xb0   :  { %v27_v5 = vmul.f32 0.5, %v49_v4 }
  0xb2   :  { %v28_v6 = vmul.f32 %v27_v5, %v21_v0 }
  0xb4   :  { %v29_v7 = vpack.c.bf16 %v28_v6, %v28_v6 }
  0xb6   :  { %30 = vst [vmem:[#allocation5] sm:$0xf] %v29_v7 }
  0xb7   :  { %83 = shalt.err (!%p80_p12)
}
  0xb8   :  { %s84_s22 = scalar_lea.hbm %s135_s1, 64 }
  0xb9   :  { %p85_p13 = scmp.ne.s32.totalorder %s135_s1, %s84_s22  ;;  %p88_p0 = scmp.lt.u32.totalorder %s84_s22, %s135_s1 }
  0xbb   :  { %p90_p1 = pnand %p88_p0, %p85_p13 }
  0xbd   :  { %93 = shalt.err (!%p90_p1)
}
  0xbe   :  { %40 = dma.vmem_to_hbm [thread:$0]  %s38_s19, 64, %s135_s1, [#allocation4]  }
  0xbf   :  { %96 = dma.done.wait [#allocation4], 64  }
  0xc0   :  { %97 = vsyncadd [#allocation4], 4294967232 }
  0xc1   :  { %44 = vsyncpa [#allocation3], 1 }
  0xc2   :  { %45 = vsyncpa [#allocation4], 1 }

</bundles_post_ra>
